<compile_context>
chip_gen: v5e
topology: v5e:2x2
jax: 0.10.0
libtpu: 0.0.40
codegen_flags: <defaults>
</compile_context>

<pallas_src>
import jax
import jax.numpy as jnp
from jax import lax
from jax.experimental import pallas as pl
from jax.experimental.pallas import tpu as pltpu

EPS = 1e-8                     # matches torch F.cosine_similarity default eps
OUT_LANES = 128                # lane-dense padded output width (score broadcast, col 0 used)
FEAT_DTYPE = jnp.bfloat16      # feature inputs in bf16 (halves DMA bytes, esp. on v5e);
                               # all in-kernel accumulation is f32.


def entity_score_kernel(qw_ref, qc_ref, ew_ref, ec_ref, w_ref, b_ref, out_ref):
    """One batch tile: pool question/entity features, fused projection, cosine score."""
    h = w_ref.shape[1] // 2

    # ---- pooling (f32 accumulation). Question features arrive pre-scaled by mask/count,
    #      so the masked mean is just a sum; entity side is a plain mean. ----
    q_pool_w = jnp.sum(qw_ref[...].astype(jnp.float32), axis=1)       # [TB, Dw]
    q_pool_c = jnp.sum(qc_ref[...].astype(jnp.float32), axis=1)       # [TB, Dc]
    e_pool_w = jnp.mean(ew_ref[...].astype(jnp.float32), axis=1)      # [TB, Dw]
    e_pool_c = jnp.mean(ec_ref[...].astype(jnp.float32), axis=1)      # [TB, Dc]

    # ---- fused projection: single MXU pass against block-diag [[wq, 0], [0, we]] ----
    lhs = jnp.concatenate([q_pool_w, q_pool_c, e_pool_w, e_pool_c], axis=-1)  # [TB, 2D]
    proj = jnp.dot(lhs, w_ref[...],
                   preferred_element_type=jnp.float32) + b_ref[...]          # [TB, 2H]
    q_emb = proj[:, :h]                                                       # [TB, H]
    e_emb = proj[:, h:]                                                       # [TB, H]

    # ---- cosine similarity: per-norm eps clamp (PyTorch semantics), rsqrt on the EUP ----
    num = jnp.sum(q_emb * e_emb, axis=-1, keepdims=True)                      # [TB, 1]
    nq2 = jnp.sum(q_emb * q_emb, axis=-1, keepdims=True)
    ne2 = jnp.sum(e_emb * e_emb, axis=-1, keepdims=True)
    eps2 = jnp.float32(EPS * EPS)
    score = num * lax.rsqrt(jnp.maximum(nq2, eps2)) * lax.rsqrt(jnp.maximum(ne2, eps2))

    # ---- lane-dense store: broadcast score across all 128 lanes (col 0 sliced in JAX) ----
    out_ref[...] = jnp.broadcast_to(score, out_ref.shape)


def _prep_inputs(words, chars, e_words, e_chars, mask, params):
    """JAX glue: embedding gathers + mask/count scale folded into the gather fusion."""
    w_emb, c_emb = params["word_emb"], params["char_emb"]
    m = mask.astype(jnp.float32)                                   # [B, Lq]
    cnt = jnp.maximum(jnp.sum(m, axis=1, keepdims=True), 1.0)      # [B, 1]
    scale = (m / cnt)[..., None]                                   # [B, Lq, 1]

    q_w = (w_emb[words] * scale).astype(FEAT_DTYPE)                # [B, Lq, Dw]
    q_c = (jnp.mean(c_emb[chars], axis=2) * scale).astype(FEAT_DTYPE)   # [B, Lq, Dc]
    e_w = w_emb[e_words].astype(FEAT_DTYPE)                        # [B, Le, Dw]
    e_c = jnp.mean(c_emb[e_chars], axis=2).astype(FEAT_DTYPE)      # [B, Le, Dc]
    return q_w, q_c, e_w, e_c


def _pick_block_b(b):
    """Largest batch tile that divides B and respects the (8, x) sublane rule."""
    if b <= 512:
        return b
    for tb in (512, 256, 128, 64, 32, 16, 8):
        if b % tb == 0:
            return tb
    return b


def entity_model_forward(words, chars, e_words, e_chars, mask, params):
    q_w, q_c, e_w, e_c = _prep_inputs(words, chars, e_words, e_chars, mask, params)
    B, Lq, Dw = q_w.shape
    Dc = q_c.shape[-1]
    Le = e_w.shape[1]
    D = Dw + Dc
    H = params["wq"].shape[1]

    # Fused block-diagonal weight [[wq, 0], [0, we]] : [2D, 2H]; fused bias [bq | be] : [1, 2H].
    z = jnp.zeros((D, H), jnp.float32)
    w_blk = jnp.concatenate(
        [jnp.concatenate([params["wq"].astype(jnp.float32), z], axis=1),
         jnp.concatenate([z, params["we"].astype(jnp.float32)], axis=1)], axis=0)
    b_cat = jnp.concatenate([params["bq"], params["be"]], axis=1).astype(jnp.float32)

    tb = _pick_block_b(B)
    grid = (B // tb,)

    cost = pl.CostEstimate(
        flops=2 * B * (Lq + Le) * D + 2 * B * (2 * D) * (2 * H) + 6 * B * H,
        transcendentals=2 * B,
        bytes_accessed=(B * (Lq + Le) * D * 2          # bf16 features
                        + (2 * D * 2 * H + 2 * H) * 4  # fused weight + bias
                        + B * OUT_LANES * 4),          # padded output
    )

    score_padded = pl.pallas_call(
        entity_score_kernel,
        out_shape=jax.ShapeDtypeStruct((B, OUT_LANES), jnp.float32),
        grid=grid,
        in_specs=[
            pl.BlockSpec((tb, Lq, Dw), lambda i: (i, 0, 0)),
            pl.BlockSpec((tb, Lq, Dc), lambda i: (i, 0, 0)),
            pl.BlockSpec((tb, Le, Dw), lambda i: (i, 0, 0)),
            pl.BlockSpec((tb, Le, Dc), lambda i: (i, 0, 0)),
            pl.BlockSpec((2 * D, 2 * H), lambda i: (0, 0)),   # weights broadcast to all tiles
            pl.BlockSpec((1, 2 * H), lambda i: (0, 0)),
        ],
        out_specs=pl.BlockSpec((tb, OUT_LANES), lambda i: (i, 0)),
        compiler_params=pltpu.CompilerParams(
            dimension_semantics=("parallel",),        # shard batch tiles across TCs (v7x)
            vmem_limit_bytes=32 * 1024 * 1024,        # raise further for production tiles
        ),
        cost_estimate=cost,
    )(q_w, q_c, e_w, e_c, w_blk, b_cat)

    return score_padded[:, 0]   # [B]


def reference_forward(words, chars, e_words, e_chars, mask, params):
    """Pure-JAX reference (same bf16 input rounding point as the kernel path)."""
    q_w, q_c, e_w, e_c = _prep_inputs(words, chars, e_words, e_chars, mask, params)
    q_pool = jnp.concatenate([q_w.astype(jnp.float32).sum(axis=1),
                              q_c.astype(jnp.float32).sum(axis=1)], axis=-1)   # masked mean
    e_pool = jnp.concatenate([e_w.astype(jnp.float32).mean(axis=1),
                              e_c.astype(jnp.float32).mean(axis=1)], axis=-1)
    q = q_pool @ params["wq"] + params["bq"][0]
    e = e_pool @ params["we"] + params["be"][0]
    num = jnp.sum(q * e, axis=-1)
    nq = jnp.maximum(jnp.linalg.norm(q, axis=-1), EPS)
    ne = jnp.maximum(jnp.linalg.norm(e, axis=-1), EPS)
    return num / (nq * ne)


if __name__ == "__main__":
    # small, deterministic synthetic shapes
    B, Lq, Le, C = 2, 8, 4, 4       # batch, question len, entity len, chars per token
    V, Vc = 50, 30                  # word / char vocab sizes
    Dw, Dc, H = 24, 8, 32           # word dim, char dim, output embedding dim
    D = Dw + Dc

    key = jax.random.PRNGKey(0)
    ks = jax.random.split(key, 10)

    params = {
        "word_emb": jax.random.normal(ks[0], (V, Dw), jnp.float32) * 0.1,
        "char_emb": jax.random.normal(ks[1], (Vc, Dc), jnp.float32) * 0.1,
        "wq": jax.random.normal(ks[2], (D, H), jnp.float32) * (1.0 / D ** 0.5),
        "bq": jax.random.normal(ks[3], (1, H), jnp.float32) * 0.01,
        "we": jax.random.normal(ks[4], (D, H), jnp.float32) * (1.0 / D ** 0.5),
        "be": jax.random.normal(ks[5], (1, H), jnp.float32) * 0.01,
    }

    words = jax.random.randint(ks[6], (B, Lq), 0, V)
    chars = jax.random.randint(ks[7], (B, Lq, C), 0, Vc)
    e_words = jax.random.randint(ks[8], (B, Le), 0, V)
    e_chars = jax.random.randint(ks[9], (B, Le, C), 0, Vc)
    # mask: second question has a shorter valid length
    mask = jnp.array([[1] * Lq, [1] * (Lq - 3) + [0] * 3], dtype=jnp.int32)

    score = entity_model_forward(words, chars, e_words, e_chars, mask, params)
    score = jax.block_until_ready(score)

    ref = reference_forward(words, chars, e_words, e_chars, mask, params)
    assert score.shape == (B,)
    assert jnp.allclose(score, ref, atol=1e-4, rtol=1e-4), (score, ref)

    print("KERNEL_OK")
</pallas_src>

<mosaic_0001>
module attributes {stable_mosaic.version = 11 : i64} {
  func.func @entity_score_kernel(%arg0: i32, %arg1: memref<2x8x24xbf16, #tpu.memory_space<vmem>>, %arg2: memref<2x8x8xbf16, #tpu.memory_space<vmem>>, %arg3: memref<2x4x24xbf16, #tpu.memory_space<vmem>>, %arg4: memref<2x4x8xbf16, #tpu.memory_space<vmem>>, %arg5: memref<64x64xf32, #tpu.memory_space<vmem>>, %arg6: memref<1x64xf32, #tpu.memory_space<vmem>>, %arg7: memref<2x128xf32, #tpu.memory_space<vmem>>) attributes {dimension_semantics = [#tpu.dimension_semantics<parallel>], iteration_bounds = array<i64: 1>, scalar_prefetch = 0 : i64, scratch_operands = 0 : i64, tpu.core_type = #tpu.core_type<tc>, window_params = [{transform_indices = @transform_0, window_bounds = array<i64: 2, 8, 24>}, {transform_indices = @transform_1, window_bounds = array<i64: 2, 8, 8>}, {transform_indices = @transform_2, window_bounds = array<i64: 2, 4, 24>}, {transform_indices = @transform_3, window_bounds = array<i64: 2, 4, 8>}, {pipeline_mode = #tpu.pipeline_mode<synchronous>, transform_indices = @transform_4, window_bounds = array<i64: 64, 64>}, {pipeline_mode = #tpu.pipeline_mode<synchronous>, transform_indices = @transform_5, window_bounds = array<i64: 1, 64>}, {transform_indices = @transform_6, window_bounds = array<i64: 2, 128>}]} {
    %c0 = arith.constant 0 : index
    %c0_0 = arith.constant 0 : index
    %c0_1 = arith.constant 0 : index
    %0 = vector.load %arg1[%c0, %c0_0, %c0_1] : memref<2x8x24xbf16, #tpu.memory_space<vmem>>, vector<2x8x24xbf16>
    %1 = arith.extf %0 : vector<2x8x24xbf16> to vector<2x8x24xf32>
    %cst = arith.constant dense<0.000000e+00> : vector<2x24xf32>
    %2 = vector.multi_reduction <add>, %1, %cst [1] : vector<2x8x24xf32> to vector<2x24xf32>
    %c0_2 = arith.constant 0 : index
    %c0_3 = arith.constant 0 : index
    %c0_4 = arith.constant 0 : index
    %3 = vector.load %arg2[%c0_2, %c0_3, %c0_4] : memref<2x8x8xbf16, #tpu.memory_space<vmem>>, vector<2x8x8xbf16>
    %4 = arith.extf %3 : vector<2x8x8xbf16> to vector<2x8x8xf32>
    %cst_5 = arith.constant dense<0.000000e+00> : vector<2x8xf32>
    %5 = vector.multi_reduction <add>, %4, %cst_5 [1] : vector<2x8x8xf32> to vector<2x8xf32>
    %c0_6 = arith.constant 0 : index
    %c0_7 = arith.constant 0 : index
    %c0_8 = arith.constant 0 : index
    %6 = vector.load %arg3[%c0_6, %c0_7, %c0_8] : memref<2x4x24xbf16, #tpu.memory_space<vmem>>, vector<2x4x24xbf16>
    %7 = arith.extf %6 : vector<2x4x24xbf16> to vector<2x4x24xf32>
    %cst_9 = arith.constant dense<0.000000e+00> : vector<2x24xf32>
    %8 = vector.multi_reduction <add>, %7, %cst_9 [1] : vector<2x4x24xf32> to vector<2x24xf32>
    %cst_10 = arith.constant 4.000000e+00 : f32
    %9 = vector.broadcast %cst_10 : f32 to vector<2x24xf32>
    %10 = arith.divf %8, %9 : vector<2x24xf32>
    %c0_11 = arith.constant 0 : index
    %c0_12 = arith.constant 0 : index
    %c0_13 = arith.constant 0 : index
    %11 = vector.load %arg4[%c0_11, %c0_12, %c0_13] : memref<2x4x8xbf16, #tpu.memory_space<vmem>>, vector<2x4x8xbf16>
    %12 = arith.extf %11 : vector<2x4x8xbf16> to vector<2x4x8xf32>
    %cst_14 = arith.constant dense<0.000000e+00> : vector<2x8xf32>
    %13 = vector.multi_reduction <add>, %12, %cst_14 [1] : vector<2x4x8xf32> to vector<2x8xf32>
    %cst_15 = arith.constant 4.000000e+00 : f32
    %14 = vector.broadcast %cst_15 : f32 to vector<2x8xf32>
    %15 = arith.divf %13, %14 : vector<2x8xf32>
    %16 = tpu.concatenate %2, %5, %10, %15 in 1 : vector<2x24xf32>, vector<2x8xf32>, vector<2x24xf32>, vector<2x8xf32> -> vector<2x64xf32>
    %c0_16 = arith.constant 0 : index
    %c0_17 = arith.constant 0 : index
    %17 = vector.load %arg5[%c0_16, %c0_17] : memref<64x64xf32, #tpu.memory_space<vmem>>, vector<64x64xf32>
    %cst_18 = arith.constant dense<0.000000e+00> : vector<2x64xf32>
    %18 = tpu.matmul %16, %17, %cst_18 {dimension_numbers = #tpu.dot_dimension_numbers<[1], [0], [0], [1], [0, 0, 1, 1], [], []>} : vector<2x64xf32>, vector<64x64xf32>, vector<2x64xf32> -> vector<2x64xf32>
    %c0_19 = arith.constant 0 : index
    %c0_20 = arith.constant 0 : index
    %19 = vector.load %arg6[%c0_19, %c0_20] : memref<1x64xf32, #tpu.memory_space<vmem>>, vector<1x64xf32>
    %20 = vector.broadcast %19 : vector<1x64xf32> to vector<2x64xf32>
    %21 = arith.addf %18, %20 : vector<2x64xf32>
    %22 = vector.extract_strided_slice %21 {offsets = [0, 0], sizes = [2, 32], strides = [1, 1]} : vector<2x64xf32> to vector<2x32xf32>
    %23 = vector.extract_strided_slice %21 {offsets = [0, 32], sizes = [2, 32], strides = [1, 1]} : vector<2x64xf32> to vector<2x32xf32>
    %24 = arith.mulf %22, %23 : vector<2x32xf32>
    %cst_21 = arith.constant dense<0.000000e+00> : vector<2xf32>
    %25 = vector.multi_reduction <add>, %24, %cst_21 [1] : vector<2x32xf32> to vector<2xf32>
    %26 = vector.shape_cast %25 : vector<2xf32> to vector<2x1xf32>
    %27 = arith.mulf %22, %22 : vector<2x32xf32>
    %cst_22 = arith.constant dense<0.000000e+00> : vector<2xf32>
    %28 = vector.multi_reduction <add>, %27, %cst_22 [1] : vector<2x32xf32> to vector<2xf32>
    %29 = vector.shape_cast %28 : vector<2xf32> to vector<2x1xf32>
    %30 = arith.mulf %23, %23 : vector<2x32xf32>
    %cst_23 = arith.constant dense<0.000000e+00> : vector<2xf32>
    %31 = vector.multi_reduction <add>, %30, %cst_23 [1] : vector<2x32xf32> to vector<2xf32>
    %32 = vector.shape_cast %31 : vector<2xf32> to vector<2x1xf32>
    %cst_24 = arith.constant 1.000000e-16 : f32
    %33 = vector.broadcast %cst_24 : f32 to vector<2x1xf32>
    %34 = arith.maximumf %29, %33 : vector<2x1xf32>
    %35 = math.rsqrt %34 : vector<2x1xf32>
    %36 = arith.mulf %26, %35 : vector<2x1xf32>
    %cst_25 = arith.constant 1.000000e-16 : f32
    %37 = vector.broadcast %cst_25 : f32 to vector<2x1xf32>
    %38 = arith.maximumf %32, %37 : vector<2x1xf32>
    %39 = math.rsqrt %38 : vector<2x1xf32>
    %40 = arith.mulf %36, %39 : vector<2x1xf32>
    %41 = vector.shape_cast %40 : vector<2x1xf32> to vector<2x1xf32>
    %42 = vector.broadcast %41 : vector<2x1xf32> to vector<2x128xf32>
    %c0_26 = arith.constant 0 : index
    %c0_27 = arith.constant 0 : index
    %43 = vector.load %arg7[%c0_26, %c0_27] : memref<2x128xf32, #tpu.memory_space<vmem>>, vector<2x128xf32>
    tpu.vector_store %arg7[%c0_26, %c0_27], %42 {strides = array<i32>} : memref<2x128xf32, #tpu.memory_space<vmem>>, vector<2x128xf32>,
    return
  }
  func.func @transform_0(%arg0: i32) -> (i32, i32, i32) {
    %c0_i32 = arith.constant 0 : i32
    %c0_i32_0 = arith.constant 0 : i32
    %c0_i32_1 = arith.constant 0 : i32
    return %arg0, %c0_i32, %c0_i32_0 : i32, i32, i32
  }
  func.func @transform_1(%arg0: i32) -> (i32, i32, i32) {
    %c0_i32 = arith.constant 0 : i32
    %c0_i32_0 = arith.constant 0 : i32
    %c0_i32_1 = arith.constant 0 : i32
    return %arg0, %c0_i32, %c0_i32_0 : i32, i32, i32
  }
  func.func @transform_2(%arg0: i32) -> (i32, i32, i32) {
    %c0_i32 = arith.constant 0 : i32
    %c0_i32_0 = arith.constant 0 : i32
    %c0_i32_1 = arith.constant 0 : i32
    return %arg0, %c0_i32, %c0_i32_0 : i32, i32, i32
  }
  func.func @transform_3(%arg0: i32) -> (i32, i32, i32) {
    %c0_i32 = arith.constant 0 : i32
    %c0_i32_0 = arith.constant 0 : i32
    %c0_i32_1 = arith.constant 0 : i32
    return %arg0, %c0_i32, %c0_i32_0 : i32, i32, i32
  }
  func.func @transform_4(%arg0: i32) -> (i32, i32) {
    %c0_i32 = arith.constant 0 : i32
    %c0_i32_0 = arith.constant 0 : i32
    %c0_i32_1 = arith.constant 0 : i32
    return %c0_i32, %c0_i32_0 : i32, i32
  }
  func.func @transform_5(%arg0: i32) -> (i32, i32) {
    %c0_i32 = arith.constant 0 : i32
    %c0_i32_0 = arith.constant 0 : i32
    %c0_i32_1 = arith.constant 0 : i32
    return %c0_i32, %c0_i32_0 : i32, i32
  }
  func.func @transform_6(%arg0: i32) -> (i32, i32) {
    %c0_i32 = arith.constant 0 : i32
    %c0_i32_0 = arith.constant 0 : i32
    return %arg0, %c0_i32 : i32, i32
  }
}

</mosaic_0001>

<bundles_post_ra>
// kernel: tpu_custom_call.1
= control target key start
LH: loop header
LB: loop body
LE: loop exit
PB: predicated region body
PF: predicated region fallthrough
CT: control target
= control target key end

     0   :  { %11 = vsyncpa [#allocation3], 0  ;;  %s589_s0 = inlined_call_operand.hbm [shape: bf16[2,8,24], index: 0, kind: input, shape index: {}]   ;;  %s590_s1 = inlined_call_operand.hbm [shape: bf16[2,8,8], index: 1, kind: input, shape index: {}]   ;;  %s591_s2 = inlined_call_operand.hbm [shape: bf16[2,4,24], index: 2, kind: input, shape index: {}]   ;;  %s592_s3 = inlined_call_operand.hbm [shape: bf16[2,4,8], index: 3, kind: input, shape index: {}]   ;;  %s593_s4 = inlined_call_operand.hbm [shape: f32[64,64], index: 4, kind: input, shape index: {}]   ;;  %s594_s5 = inlined_call_operand.vmem [shape: f32[1,64], index: 5, kind: input, shape index: {}]   ;;  %s595_s6 = inlined_call_operand.hbm [shape: f32[2,128], index: 6, kind: output, shape index: {}]  }
   0x1   :  { %12 = vsyncpa [#allocation6], 0 }
   0x2   :  { %13 = vsyncpa [#allocation9], 0 }
   0x3   :  { %14 = vsyncpa [#allocation4], 0  ;;  %s32_s23 = sshll.u32 %s590_s1, 4  ;;  %s501_s24 = smov [#allocation5]   ;;  %s33_s23 = int_to_ptr.hbm [resolvable:$true] %s32_s23 }
   0x4   :  { %s34_s25 = sshll.u32 %s501_s24, 4  ;;  %s502_s26 = smov 64   ;;  %s35_s25 = int_to_ptr.vmem [resolvable:$true] %s34_s25 }
   0x5   :  { %s503_s27 = smov 4   ;;  %s58_s30 = sshll.u32 %s592_s3, 4  ;;  %s59_s30 = int_to_ptr.hbm [resolvable:$true] %s58_s30 }
   0x6   :  { %40 = dma.hbm_to_vmem [thread:$0]  %s33_s23, 128, %s35_s25, [#allocation6], %s502_s26, %s502_s26, %s503_s27  }
   0x7   :  { %s504_s7 = smov [#allocation8]   ;;  %s19_s11 = sshll.u32 %s589_s0, 4  ;;  %s20_s11 = int_to_ptr.hbm [resolvable:$true] %s19_s11 }
   0x8   :  { %s60_s8 = sshll.u32 %s504_s7, 4  ;;  %s505_s1 = smov 32   ;;  %s61_s8 = int_to_ptr.vmem [resolvable:$true] %s60_s8 }
   0x9   :  { %s506_s12 = smov 2   ;;  %s45_s15 = sshll.u32 %s591_s2, 4  ;;  %s46_s15 = int_to_ptr.hbm [resolvable:$true] %s45_s15 }
   0xa   :  { %66 = dma.hbm_to_vmem [thread:$0]  %s59_s30, 64, %s61_s8, [#allocation9], %s505_s1, %s505_s1, %s506_s12  }
   0xb   :  { %s507_s16 = smov [#allocation2]   ;;  %s508_s17 = smov [#allocation7]  }
   0xc   :  { %s21_s3 = sshll.u32 %s507_s16, 4  ;;  %s47_s18 = sshll.u32 %s508_s17, 4  ;;  %s22_s3 = int_to_ptr.vmem [resolvable:$true] %s21_s3  ;;  %s48_s18 = int_to_ptr.vmem [resolvable:$true] %s47_s18 }
   0xd   :  { %27 = dma.hbm_to_vmem [thread:$0]  %s20_s11, 128, %s22_s3, [#allocation3], %s502_s26, %s502_s26, %s503_s27  }
   0xe   :  { %s71_s20 = sshll.u32 %s593_s4, 4  ;;  %s509_s21 = smov [#allocation10]   ;;  %s72_s20 = int_to_ptr.hbm [resolvable:$true] %s71_s20 }
   0xf   :  { %53 = dma.hbm_to_vmem [thread:$0]  %s46_s15, 64, %s48_s18, [#allocation6], %s505_s1, %s505_s1, %s506_s12  }
  0x10   :  { %s73_s22 = sshll.u32 %s509_s21, 4  ;;  %s510_s2 = smov 128   ;;  %s74_s22 = int_to_ptr.vmem [resolvable:$true] %s73_s22 }
  0x11   :  { %s511_s23 = smov 8  }
  0x12   :  { %79 = dma.hbm_to_vmem [thread:$0]  %s72_s20, 1024, %s74_s22, [#allocation9], %s510_s2, %s510_s2, %s511_s23  }
  0x13   :  { %493 = dma.done.wait [#allocation3], 128  }
  0x14   :  { %494 = vsyncadd [#allocation3], 4294967168 }
  0x15   :  { %495 = dma.done.wait [#allocation6], 192  }
  0x16   :  { %496 = vsyncadd [#allocation6], 4294967104 }
  0x17   :  { %497 = dma.done.wait [#allocation9], 1088  }
  0x18   :  { %498 = vsyncadd [#allocation9], 4294966208  ;;  %v512_v0 = vmov 4.0   ;;  %vm125_vm0 = vcmask 64512   ;;  %v323_v1 = vld [vmem:[#allocation5] sm:$0xff]   ;;  %vm144_vm1 = vcmask 191488  }
  0x19   :  { %343 = vrcp.f32 %v512_v0  ;;  %v140_v2 = vld [vmem:[#allocation7] sm:$0x3]  ;;  %v141_v3 = vld [vmem:[#allocation7 + $0x2] sm:$0x3]  ;;  %v324_v5 = vunpack.c.l.bf16 %v323_v1  ;;  %v325_v6 = vunpack.c.h.bf16 %v323_v1  ;;  %v168_v9 = vld [vmem:[#allocation8] sm:$0x3] }
  0x1a   :  { %v142_v7 = vunpack.c.l.bf16 %v140_v2  ;;  %v143_v8 = vunpack.c.l.bf16 %v141_v3  ;;  %v169_v10 = vld [vmem:[#allocation8 + $0x2] sm:$0x3]  ;;  %v170_v13 = vunpack.c.l.bf16 %v168_v9  ;;  %vm172_vm2 = vcmask 60416   ;;  %v223_v15 = vld [vmem:[#allocation10 + $0x30] sm:$0xff]  ;;  %v222_v20 = vld [vmem:[#allocation10 + $0x28] sm:$0xff]  ;;  %s513_s4 = smov 24  }
  0x1b   :  { %v224_v11 = vld [vmem:[#allocation10 + $0x38] sm:$0xff]  ;;  %v171_v14 = vunpack.c.l.bf16 %v169_v10  ;;  %v126_v16 = vsel %vm125_vm0, %v324_v5, 0.0  ;;  %v133_v17 = vsel %vm125_vm0, %v325_v6, 0.0  ;;  %vm191_vm4 = vcmask 1041409   ;;  %s514_s24 = smov 56   ;;  %v219_v9 = vld [vmem:[#allocation10 + $0x10] sm:$0xff] }
  0x1c   :  { %241 = vmatpush.msra.mxu0 %v224_v11  ;;  %v145_v18 = vsel %vm144_vm1, %v142_v7, 0.0  ;;  %v152_v19 = vsel %vm144_vm1, %v143_v8, 0.0  ;;  %v127_v21 = vrot.slane %v126_v16, 4  ;;  %v134_v22 = vrot.slane %v133_v17, 4  ;;  %v220_v7 = vld [vmem:[#allocation10 + $0x18] sm:$0xff]  ;;  %v319_v8 = vld [vmem:[#allocation2] sm:$0xff]  }
  0x1d   :  { %v146_v23 = vrot.slane %v145_v18, 4  ;;  %v153_v24 = vrot.slane %v152_v19, 4  ;;  %v173_v26 = vsel %vm172_vm2, %v170_v13, 0.0  ;;  %v180_v27 = vsel %vm172_vm2, %v171_v14, 0.0  ;;  %v218_v10 = vld [vmem:[#allocation10 + $0x8] sm:$0xff]  ;;  %v217_v13 = vld [vmem:[#allocation10] sm:$0xff] }
  0x1e   :  { %242 = vmatpush.msra.mxu0 %v223_v15  ;;  %v128_v28 = vadd.f32 %v127_v21, %v126_v16  ;;  %v135_v29 = vadd.f32 %v134_v22, %v133_v17  ;;  %v174_v33 = vrot.slane %v173_v26, 4  ;;  %v181_v34 = vrot.slane %v180_v27, 4  ;;  %s515_s27 = smov 96   ;;  %s305_s7 = sshll.u32 %s595_s6, 4  ;;  %s306_s7 = int_to_ptr.hbm [resolvable:$true] %s305_s7 }
  0x1f   :  { %v344_v4 = vpop.eup %343  ;;  %v147_v30 = vadd.f32 %v146_v23, %v145_v18  ;;  %v154_v31 = vadd.f32 %v153_v24, %v152_v19  ;;  %v320_v11 = vunpack.c.l.bf16 %v319_v8  ;;  %vm106_vm5 = vcmask 195584  }
  0x20   :  { %v160_v12 = vmul.f32 4.0, %v344_v4  ;;  %243 = vmatpush.msra.mxu0 %v222_v20  ;;  %v129_v35 = vrot.slane %v128_v28, 2  ;;  %v136_v36 = vrot.slane %v135_v29, 2  ;;  %v175_v39 = vadd.f32 %v174_v33, %v173_v26 }
  0x21   :  { %v148_v37 = vrot.slane %v147_v30, 2  ;;  %v155_v38 = vrot.slane %v154_v31, 2  ;;  %v182_v40 = vadd.f32 %v181_v34, %v180_v27  ;;  %vm164_vm3 = vweird.f32 %v344_v4 }
  0x22   :  { %v161_v25 = vsub.f32 1.0, %v160_v12  ;;  %v130_v41 = vadd.f32 %v129_v35, %v128_v28  ;;  %v137_v42 = vadd.f32 %v136_v36, %v135_v29  ;;  %v176_v46 = vrot.slane %v175_v39, 2  ;;  %v342_v35 = vld [vmem:[%s594_s5] ss:$0 sm:$0xff]  ;;  %s516_s5 = smov [#allocation11]  }
  0x23   :  { %v149_v43 = vadd.f32 %v148_v37, %v147_v30  ;;  %v156_v44 = vadd.f32 %v155_v38, %v154_v31  ;;  %v183_v47 = vrot.slane %v182_v40, 2  ;;  %v321_v12 = vunpack.c.h.bf16 %v319_v8  ;;  %s303_s28 = sshll.u32 %s516_s5, 4  ;;  %s304_s28 = int_to_ptr.vmem [resolvable:$true] %s303_s28 }
  0x24   :  { %v162_v32 = vmul.f32 %v344_v4, %v161_v25  ;;  %v131_v48 = vrot.slane %v130_v41, 1  ;;  %v138_v49 = vrot.slane %v137_v42, 1  ;;  %v177_v52 = vadd.f32 %v176_v46, %v175_v39 }
  0x25   :  { %v150_v50 = vrot.slane %v149_v43, 1  ;;  %v157_v51 = vrot.slane %v156_v44, 1  ;;  %v184_v53 = vadd.f32 %v183_v47, %v182_v40  ;;  %v107_v14 = vsel %vm106_vm5, %v320_v11, 0.0 }
  0x26   :  { %v163_v45 = vadd.f32 %v344_v4, %v162_v32  ;;  %v132_v54 = vadd.f32 %v131_v48, %v130_v41  ;;  %v139_v55 = vadd.f32 %v138_v49, %v137_v42  ;;  %v178_v59 = vrot.slane %v177_v52, 1 }
  0x27   :  { %v151_v56 = vadd.f32 %v150_v50, %v149_v43  ;;  %v158_v57 = vadd.f32 %v157_v51, %v156_v44  ;;  %v185_v60 = vrot.slane %v184_v53, 1  ;;  %v114_v15 = vsel %vm106_vm5, %v321_v12, 0.0 }
  0x28   :  { %v165_v58 = vsel %vm164_vm3, %v344_v4, %v163_v45  ;;  %v196_v61 = vsel %vm191_vm4, %v139_v55, %v132_v54  ;;  %v179_v62 = vadd.f32 %v178_v59, %v177_v52  ;;  %v221_v4 = vld [vmem:[#allocation10 + $0x20] sm:$0xff]  ;;  %v108_v16 = vrot.slane %v107_v14, 4 }
  0x29   :  { %197 = vrot.lane.b32.xlu0 %v196_v61, %s513_s4  ;;  %v186_v63 = vadd.f32 %v185_v60, %v184_v53  ;;  %v166_v0 = vmul.f32 %v165_v58, %v151_v56  ;;  %v167_v1 = vmul.f32 %v165_v58, %v158_v57  ;;  %244 = vmatpush.msra.mxu0 %v221_v4  ;;  %v115_v17 = vrot.slane %v114_v15, 4 }
  0x2a   :  { %v187_v2 = vmul.f32 %v179_v62, %v165_v58  ;;  %v109_v18 = vadd.f32 %v108_v16, %v107_v14  ;;  %vm213_vm6 = vcmask 261120   ;;  %vm215_vm7 = vcmask 457728  }
  0x2b   :  { %v188_v3 = vmul.f32 %v186_v63, %v165_v58  ;;  %v202_v6 = vsel %vm191_vm4, %v167_v1, %v166_v0  ;;  %245 = vmatpush.msra.mxu0 %v220_v7  ;;  %v116_v19 = vadd.f32 %v115_v17, %v114_v15  ;;  %vm229_vm8 = vcmask 523264  }
  0x2c   :  { %v110_v20 = vrot.slane %v109_v18, 2  ;;  %vm258_vm9 = vcmask 254976  }
  0x2d   :  { %v208_v5 = vsel %vm191_vm4, %v188_v3, %v187_v2  ;;  %246 = vmatpush.msra.mxu0 %v219_v9  ;;  %v117_v21 = vrot.slane %v116_v19, 2 }
  0x2e   :  { %209 = vrot.lane.b32.xlu1 %v208_v5, %s514_s24  ;;  %v111_v22 = vadd.f32 %v110_v20, %v109_v18 }
  0x2f   :  { %247 = vmatpush.msra.mxu0 %v218_v10  ;;  %v118_v23 = vadd.f32 %v117_v21, %v116_v19 }
  0x30   :  { %v112_v24 = vrot.slane %v111_v22, 1 }
  0x31   :  { %203 = vrot.lane.b32.xlu0 %v202_v6, %s505_s1  ;;  %248 = vmatpush.msra.mxu0 %v217_v13  ;;  %v119_v25 = vrot.slane %v118_v23, 1 }
  0x32   :  { %v113_v27 = vadd.f32 %v112_v24, %v111_v22 }
  0x33   :  { %v120_v28 = vadd.f32 %v119_v25, %v118_v23 }
  0x35   :  { %v192_v29 = vsel %vm191_vm4, %v120_v28, %v113_v27 }
  0x9b   :  { %v198_v26 = vpop.permute.xlu0 %197 }
  0x9c   :  { %v212_v31 = vsel %vm106_vm5, %v192_v29, %v198_v26 }
  0xa0   :  { %v210_v30 = vpop.permute.xlu1 %209 }
  0xa3   :  { %v204_v32 = vpop.permute.xlu0 %203 }
  0xa4   :  { %v214_v33 = vsel %vm213_vm6, %v212_v31, %v204_v32 }
  0xa5   :  { %v216_v34 = vsel %vm215_vm7, %v214_v33, %v210_v30 }
  0xa6   :  { %317 = vmatmul.msk.f32.vlgmr.msra.gmra.mxu0 %vm229_vm8, %v216_v34 }
 0x123   :  { %v250_v36 = vpop.f32.mrf.mxu0 }
 0x124   :  { %v251_v37 = vadd.f32 %v342_v35, %v250_v36 }
 0x126   :  { %254 = vrot.lane.b32.xlu2 %v251_v37, %s515_s27  ;;  %v262_v38 = vmul.f32 %v251_v37, %v251_v37 }
 0x128   :  { %267 = vrot.lane.b32.xlu1 %v262_v38, %s515_s27  ;;  %v263_v39 = vsel %vm258_vm9, %v262_v38, 0.0 }
 0x14f   :  { %264 = vadd.xlane.f32.xlu2 %v263_v39 }
 0x180   :  { %v255_v40 = vpop.permute.xlu2 %254 }
 0x181   :  { %v257_v41 = vmul.f32 %v255_v40, %v251_v37 }
 0x183   :  { %v259_v42 = vsel %vm258_vm9, %v257_v41, 0.0 }
 0x184   :  { %260 = vadd.xlane.f32.xlu1 %v259_v42 }
 0x19a   :  { %v268_v43 = vpop.permute.xlu1 %267 }
 0x19b   :  { %v270_v44 = vsel %vm258_vm9, %v268_v43, 0.0 }
 0x19c   :  { %271 = vadd.xlane.f32.xlu0 %v270_v44 }
 0x1c2   :  { %v265_v45 = vpop.xlane.xlu2 %264 }
 0x1c3   :  { %v273_v46 = vmax.f32 %v265_v45, 1e-16 }
 0x1c5   :  { %345 = vrsqrt.f32 %v273_v46  ;;  %vm280_vm11 = vweird.f32 %v273_v46 }
 0x1cb   :  { %v346_v47 = vpop.eup %345 }
 0x1cc   :  { %v275_v48 = vmul.f32 %v346_v47, %v273_v46  ;;  %vm281_vm10 = vweird.f32 %v346_v47 }
 0x1cd   :  { %vm282_vm13 = vmor %vm280_vm11, %vm281_vm10 }
 0x1ce   :  { %v276_v51 = vmul.f32 %v346_v47, %v275_v48 }
 0x1d0   :  { %v277_v52 = vmul.f32 0.5, %v276_v51 }
 0x1d2   :  { %v278_v54 = vsub.f32 1.5, %v277_v52 }
 0x1d4   :  { %v279_v57 = vmul.f32 %v346_v47, %v278_v54 }
 0x1d6   :  { %v283_v61 = vsel %vm282_vm13, %v346_v47, %v279_v57 }
 0x1f7   :  { %v261_v59 = vpop.xlane.xlu1 %260 }
 0x1f8   :  { %v284_v63 = vmul.f32 %v283_v61, %v261_v59 }
 0x20f   :  { %v272_v49 = vpop.xlane.xlu0 %271 }
 0x210   :  { %v285_v50 = vmax.f32 %v272_v49, 1e-16 }
 0x212   :  { %347 = vrsqrt.f32 %v285_v50  ;;  %vm292_vm14 = vweird.f32 %v285_v50 }
 0x218   :  { %v348_v53 = vpop.eup %347 }
 0x219   :  { %v287_v55 = vmul.f32 %v348_v53, %v285_v50  ;;  %vm293_vm12 = vweird.f32 %v348_v53 }
 0x21a   :  { %vm294_vm15 = vmor %vm292_vm14, %vm293_vm12 }
 0x21b   :  { %v288_v56 = vmul.f32 %v348_v53, %v287_v55 }
 0x21d   :  { %v289_v58 = vmul.f32 0.5, %v288_v56 }
 0x21f   :  { %v290_v60 = vsub.f32 1.5, %v289_v58 }
 0x221   :  { %v291_v62 = vmul.f32 %v348_v53, %v290_v60 }
 0x223   :  { %v295_v0 = vsel %vm294_vm15, %v348_v53, %v291_v62 }
 0x224   :  { %v296_v1 = vmul.f32 %v295_v0, %v284_v63 }
 0x226   :  { %297 = vst [vmem:[#allocation11] sm:$0x3] %v296_v1 }
 0x227   :  { %308 = dma.vmem_to_hbm [thread:$0]  %s304_s28, 32, %s306_s7, [#allocation4]  }
 0x228   :  { %499 = dma.done.wait [#allocation4], 32  }
 0x229   :  { %500 = vsyncadd [#allocation4], 4294967264 }
 0x22a   :  { %313 = vsyncpa [#allocation3], 1 }
 0x22b   :  { %314 = vsyncpa [#allocation6], 1 }
 0x22c   :  { %315 = vsyncpa [#allocation9], 1 }
 0x22d   :  { %316 = vsyncpa [#allocation4], 1 }

</bundles_post_ra>
